<compile_context>
chip_gen: v5e
topology: v5e:2x2
jax: 0.10.0
libtpu: 0.0.40
codegen_flags: <defaults>
</compile_context>

<pallas_src>
import math

import jax
import jax.numpy as jnp
from jax.experimental import pallas as pl
from jax.experimental.pallas import tpu as pltpu


def _gelu_tanh(x):
    # PyTorch F.gelu(x, approximate='tanh')
    c = math.sqrt(2.0 / math.pi)
    return 0.5 * x * (1.0 + jnp.tanh(c * (x + 0.044715 * x * x * x)))


def _make_block_kernel(gelu_dtype):
    def block_mlp_kernel(x_ref, w1_ref, b1_ref, w2_ref, b2_ref, o_ref, acc_ref):
        h_idx = pl.program_id(1)

        @pl.when(h_idx == 0)
        def _():
            # Fold b2 into the accumulator init: saves a full (tile_b, dim)
            # f32 add + store pass in the epilogue.
            acc_ref[...] = jnp.broadcast_to(
                b2_ref[...].astype(jnp.float32), acc_ref.shape)

        # Native-dtype operands straight to the MXU; f32 accumulation.
        x = x_ref[...]                                    # (tile_b, dim)
        h = jnp.dot(x, w1_ref[...],                       # (tile_b, tile_h)
                    preferred_element_type=jnp.float32)
        h = h + b1_ref[...].astype(jnp.float32)           # (1, tile_h) broadcasts
        # GELU in gelu_dtype (bf16 on v6e/v7x small-dim bf16 configs, else f32).
        h = _gelu_tanh(h.astype(gelu_dtype))

        # Second matmul chunk, accumulated over the hidden axis.
        acc_ref[...] += jnp.dot(h.astype(w2_ref.dtype), w2_ref[...],
                                preferred_element_type=jnp.float32)

        @pl.when(h_idx == pl.num_programs(1) - 1)
        def _():
            o_ref[...] = (x.astype(jnp.float32) + acc_ref[...]).astype(o_ref.dtype)

    return block_mlp_kernel


def _tpu_generation():
    """Best-effort (vmem_capacity_bytes, is_v7x, is_v5e) for the local device."""
    kind = ""
    try:
        kind = jax.devices()[0].device_kind.lower()
    except Exception:
        pass
    vmem_bytes = None
    try:
        info = pltpu.get_tpu_info()
        vmem_bytes = int(getattr(info, "vmem_capacity_bytes"))
    except Exception:
        vmem_bytes = None
    is_v7x = "v7" in kind
    is_v5e = ("v5e" in kind) or ("v5 lite" in kind) or ("v5litepod" in kind)
    if vmem_bytes is None:
        vmem_bytes = (64 << 20) if is_v7x else (128 << 20)
    else:
        is_v7x = is_v7x or vmem_bytes <= (64 << 20)
    return vmem_bytes, is_v7x, is_v5e


def _pick_tile(total, target, aligns=(256, 128, 8, 1)):
    """Largest divisor of `total` that is <= target and a multiple of one of
    `aligns` (tried in order of preference). Falls back to `total`."""
    target = max(1, min(total, int(target)))
    for align in aligns:
        if align > total:
            continue
        t = (target // align) * align
        while t >= align:
            if total % t == 0:
                return t
            t -= align
    return total


def _vmem_footprint(tile_b, tile_h, dim, x_itemsize, w_itemsize, w_bufs=2):
    """Actual VMEM bytes used by the pipelined tiles (double-buffer included)."""
    return (2 * tile_b * dim * x_itemsize          # x tiles (double-buffered)
            + 2 * tile_b * dim * x_itemsize        # output tiles
            + w_bufs * dim * tile_h * w_itemsize   # W1 column blocks
            + w_bufs * tile_h * dim * w_itemsize   # W2 row blocks
            + 2 * (tile_h + dim) * w_itemsize      # biases
            + tile_b * dim * 4)                    # f32 accumulator


def block_forward(x, w1, b1, w2, b2, *, tile_b=None, tile_h=None,
                  gelu_in_bf16=None):
    """x: (B, dim); w1: (dim, 4*dim); b1: (4*dim,); w2: (4*dim, dim); b2: (dim,).

    NOTE: for production (f32 checkpoints), cast x/w1/w2 to bf16 before calling
    this — it halves the dominant weight HBM traffic and runs the MXU at its
    bf16 rate while the kernel keeps f32 accumulation.
    """
    B, dim = x.shape
    hidden = w1.shape[1]

    vmem_phys, is_v7x, is_v5e = _tpu_generation()
    # Scoped-VMEM cap: generous on 128-MiB parts, headroom on v7x's 64 MiB.
    vmem_cap = min(int(0.85 * vmem_phys),
                   (56 << 20) if is_v7x else (110 << 20))
    w_bufs = 3 if is_v5e else 2   # deeper weight pipelining on v5e (slow HBM)

    x_it = jnp.dtype(x.dtype).itemsize
    w_it = jnp.dtype(w1.dtype).itemsize

    # tile_h: smaller on v7x so a large tile_b fits 64 MiB.  Weight HBM traffic
    # does not depend on tile_h, only on B/tile_b.
    if tile_h is None:
        tile_h = _pick_tile(hidden, 256 if is_v7x else 512, (128, 8, 1))

    if tile_b is None:
        budget = vmem_cap - (4 << 20)
        # If even a minimal batch tile does not fit (very large dim), shrink
        # tile_h first — it is free w.r.t. HBM traffic.
        min_tb = B if B < 8 else (128 if B >= 128 else 8)
        while (_vmem_footprint(min_tb, tile_h, dim, x_it, w_it, w_bufs) > budget
               and tile_h > 128 and tile_h % 2 == 0
               and hidden % (tile_h // 2) == 0):
            tile_h //= 2
        # TODO(synk): for very large dim (>~8K) on v7x add an output-dim (third
        # grid axis) tiling instead of shrinking tile_h/tile_b further.
        per_row = dim * (4 * x_it + 4)           # x + out (x2 buf) + f32 acc
        fixed = _vmem_footprint(0, tile_h, dim, x_it, w_it, w_bufs)
        max_tb = (budget - fixed) // per_row if budget > fixed else 8
        target_tb = min(B, 1024, max(8, int(max_tb)))
        if is_v7x and B >= 16:
            # >=2 batch tiles so the "parallel" axis shards across both TCs.
            target_tb = min(target_tb, B // 2)
        tile_b = _pick_tile(B, target_tb, (256, 128, 8, 1))

    assert B % tile_b == 0, (B, tile_b)
    assert hidden % tile_h == 0, (hidden, tile_h)

    # bf16 GELU only when the data is already bf16 (no extra precision loss)
    # and the config is in the VALU/EUP-bound small-dim regime; never on v5e.
    if gelu_in_bf16 is None:
        gelu_in_bf16 = (not is_v5e) and dim <= 512 and x.dtype == jnp.bfloat16
    gelu_dtype = jnp.bfloat16 if gelu_in_bf16 else jnp.float32

    b1_2d = b1.reshape(1, hidden)
    b2_2d = b2.reshape(1, dim)

    # VMEM request: the footprint already includes the double/triple buffering,
    # so ask for est + ~4 MiB of headroom (capped per-generation above).
    est = _vmem_footprint(tile_b, tile_h, dim, x_it, w_it, w_bufs)
    vmem_limit = int(min(vmem_cap, max(24 << 20, est + (4 << 20))))

    def _wspec(shape, index_map):
        if w_bufs > 2:
            try:
                return pl.BlockSpec(shape, index_map,
                                    pipeline_mode=pl.Buffered(w_bufs))
            except Exception:
                pass
        return pl.BlockSpec(shape, index_map)

    grid = (B // tile_b, hidden // tile_h)
    return pl.pallas_call(
        _make_block_kernel(gelu_dtype),
        out_shape=jax.ShapeDtypeStruct((B, dim), x.dtype),
        grid_spec=pltpu.PrefetchScalarGridSpec(
            num_scalar_prefetch=0,
            grid=grid,
            in_specs=[
                pl.BlockSpec((tile_b, dim), lambda i, h: (i, 0)),   # x tile
                _wspec((dim, tile_h), lambda i, h: (0, h)),         # W1 cols
                pl.BlockSpec((1, tile_h), lambda i, h: (0, h)),     # b1 chunk
                _wspec((tile_h, dim), lambda i, h: (h, 0)),         # W2 rows
                pl.BlockSpec((1, dim), lambda i, h: (0, 0)),        # b2
            ],
            out_specs=pl.BlockSpec((tile_b, dim), lambda i, h: (i, 0)),
            scratch_shapes=[pltpu.VMEM((tile_b, dim), jnp.float32)],
        ),
        compiler_params=pltpu.CompilerParams(
            dimension_semantics=("parallel", "arbitrary"),
            vmem_limit_bytes=vmem_limit,
        ),
    )(x, w1, b1_2d, w2, b2_2d)


def block_forward_ref(x, w1, b1, w2, b2):
    h = x @ w1 + b1
    h = _gelu_tanh(h)
    y = h @ w2 + b2
    return x + y


if __name__ == "__main__":
    key = jax.random.PRNGKey(0)
    batch, dim = 16, 128
    hidden = 4 * dim

    k_x, k_w1, k_b1, k_w2, k_b2 = jax.random.split(key, 5)
    x = jax.random.normal(k_x, (batch, dim), dtype=jnp.float32)

    # Deterministic init, mimicking nn.Linear's uniform(-1/sqrt(in), 1/sqrt(in)).
    bound1 = 1.0 / math.sqrt(dim)
    w1 = jax.random.uniform(k_w1, (dim, hidden), jnp.float32, -bound1, bound1)
    b1 = jax.random.uniform(k_b1, (hidden,), jnp.float32, -bound1, bound1)
    bound2 = 1.0 / math.sqrt(hidden)
    w2 = jax.random.uniform(k_w2, (hidden, dim), jnp.float32, -bound2, bound2)
    b2 = jax.random.uniform(k_b2, (dim,), jnp.float32, -bound2, bound2)

    ref = block_forward_ref(x, w1, b1, w2, b2)

    # 1) Explicit small tiles: exercises multiple batch tiles and multiple
    #    hidden-accumulation steps (2 x 4 grid).
    out = block_forward(x, w1, b1, w2, b2, tile_b=8, tile_h=128)
    out = jax.block_until_ready(out)
    assert out.shape == (batch, dim)
    assert jnp.allclose(out, ref, atol=1e-4, rtol=1e-4), "mismatch (explicit tiles)"

    # 2) Auto-selected (generation-aware) tiles.
    out_auto = jax.block_until_ready(block_forward(x, w1, b1, w2, b2))
    assert jnp.allclose(out_auto, ref, atol=1e-4, rtol=1e-4), "mismatch (auto tiles)"

    # 3) bf16 data path (the production configuration the kernel targets);
    #    looser tolerance because inputs/weights are quantized to bf16.
    xb = x.astype(jnp.bfloat16)
    w1b, b1b = w1.astype(jnp.bfloat16), b1.astype(jnp.bfloat16)
    w2b, b2b = w2.astype(jnp.bfloat16), b2.astype(jnp.bfloat16)
    ref_b = block_forward_ref(xb.astype(jnp.float32), w1b.astype(jnp.float32),
                              b1b.astype(jnp.float32), w2b.astype(jnp.float32),
                              b2b.astype(jnp.float32))
    out_b = jax.block_until_ready(block_forward(xb, w1b, b1b, w2b, b2b))
    assert jnp.allclose(out_b.astype(jnp.float32), ref_b, atol=1e-1, rtol=1e-1), \
        "mismatch (bf16 path)"

    print("KERNEL_OK")
</pallas_src>

<mosaic_0001>
module attributes {stable_mosaic.version = 11 : i64} {
  func.func @block_mlp_kernel(%arg0: i32, %arg1: i32, %arg2: memref<8x128xf32, #tpu.memory_space<vmem>>, %arg3: memref<128x128xf32, #tpu.memory_space<vmem>>, %arg4: memref<1x128xf32, #tpu.memory_space<vmem>>, %arg5: memref<128x128xf32, #tpu.memory_space<vmem>>, %arg6: memref<1x128xf32, #tpu.memory_space<vmem>>, %arg7: memref<8x128xf32, #tpu.memory_space<vmem>>, %arg8: memref<8x128xf32, #tpu.memory_space<vmem>>) attributes {dimension_semantics = [#tpu.dimension_semantics<parallel>, #tpu.dimension_semantics<arbitrary>], iteration_bounds = array<i64: 2, 4>, scalar_prefetch = 0 : i64, scratch_operands = 1 : i64, tpu.core_type = #tpu.core_type<tc>, window_params = [{transform_indices = @transform_0, window_bounds = array<i64: 8, 128>}, {transform_indices = @transform_1, window_bounds = array<i64: 128, 128>}, {transform_indices = @transform_2, window_bounds = array<i64: 1, 128>}, {transform_indices = @transform_3, window_bounds = array<i64: 128, 128>}, {pipeline_mode = #tpu.pipeline_mode<synchronous>, transform_indices = @transform_4, window_bounds = array<i64: 1, 128>}, {transform_indices = @transform_5, window_bounds = array<i64: 8, 128>}]} {
    %c0_i32 = arith.constant 0 : i32
    %0 = arith.cmpi eq, %arg1, %c0_i32 : i32
    %1 = arith.extui %0 : i1 to i32
    %c0_i32_0 = arith.constant 0 : i32
    %2 = arith.cmpi ne, %1, %c0_i32_0 : i32
    scf.if %2 {
      %c0_18 = arith.constant 0 : index
      %c0_19 = arith.constant 0 : index
      %30 = vector.load %arg6[%c0_18, %c0_19] : memref<1x128xf32, #tpu.memory_space<vmem>>, vector<1x128xf32>
      %31 = vector.shape_cast %30 : vector<1x128xf32> to vector<1x128xf32>
      %32 = vector.broadcast %31 : vector<1x128xf32> to vector<8x128xf32>
      %c0_20 = arith.constant 0 : index
      %c0_21 = arith.constant 0 : index
      %33 = vector.load %arg8[%c0_20, %c0_21] : memref<8x128xf32, #tpu.memory_space<vmem>>, vector<8x128xf32>
      tpu.vector_store %arg8[%c0_20, %c0_21], %32 {strides = array<i32>} : memref<8x128xf32, #tpu.memory_space<vmem>>, vector<8x128xf32>,
    } else {
    }
    %c0 = arith.constant 0 : index
    %c0_1 = arith.constant 0 : index
    %3 = vector.load %arg2[%c0, %c0_1] : memref<8x128xf32, #tpu.memory_space<vmem>>, vector<8x128xf32>
    %c0_2 = arith.constant 0 : index
    %c0_3 = arith.constant 0 : index
    %4 = vector.load %arg3[%c0_2, %c0_3] : memref<128x128xf32, #tpu.memory_space<vmem>>, vector<128x128xf32>
    %cst = arith.constant dense<0.000000e+00> : vector<8x128xf32>
    %5 = tpu.matmul %3, %4, %cst {dimension_numbers = #tpu.dot_dimension_numbers<[1], [0], [0], [1], [0, 0, 1, 1], [], []>} : vector<8x128xf32>, vector<128x128xf32>, vector<8x128xf32> -> vector<8x128xf32>
    %c0_4 = arith.constant 0 : index
    %c0_5 = arith.constant 0 : index
    %6 = vector.load %arg4[%c0_4, %c0_5] : memref<1x128xf32, #tpu.memory_space<vmem>>, vector<1x128xf32>
    %7 = vector.broadcast %6 : vector<1x128xf32> to vector<8x128xf32>
    %8 = arith.addf %5, %7 : vector<8x128xf32>
    %cst_6 = arith.constant 5.000000e-01 : f32
    %9 = vector.broadcast %cst_6 : f32 to vector<8x128xf32>
    %10 = arith.mulf %9, %8 : vector<8x128xf32>
    %cst_7 = arith.constant 4.471500e-02 : f32
    %11 = vector.broadcast %cst_7 : f32 to vector<8x128xf32>
    %12 = arith.mulf %11, %8 : vector<8x128xf32>
    %13 = arith.mulf %12, %8 : vector<8x128xf32>
    %14 = arith.mulf %13, %8 : vector<8x128xf32>
    %15 = arith.addf %8, %14 : vector<8x128xf32>
    %cst_8 = arith.constant 0.797884583 : f32
    %16 = vector.broadcast %cst_8 : f32 to vector<8x128xf32>
    %17 = arith.mulf %16, %15 : vector<8x128xf32>
    %18 = math.tanh %17 : vector<8x128xf32>
    %cst_9 = arith.constant 1.000000e+00 : f32
    %19 = vector.broadcast %cst_9 : f32 to vector<8x128xf32>
    %20 = arith.addf %19, %18 : vector<8x128xf32>
    %21 = arith.mulf %10, %20 : vector<8x128xf32>
    %c0_10 = arith.constant 0 : index
    %c0_11 = arith.constant 0 : index
    %22 = vector.load %arg8[%c0_10, %c0_11] : memref<8x128xf32, #tpu.memory_space<vmem>>, vector<8x128xf32>
    %c0_12 = arith.constant 0 : index
    %c0_13 = arith.constant 0 : index
    %23 = vector.load %arg5[%c0_12, %c0_13] : memref<128x128xf32, #tpu.memory_space<vmem>>, vector<128x128xf32>
    %cst_14 = arith.constant dense<0.000000e+00> : vector<8x128xf32>
    %24 = tpu.matmul %21, %23, %cst_14 {dimension_numbers = #tpu.dot_dimension_numbers<[1], [0], [0], [1], [0, 0, 1, 1], [], []>} : vector<8x128xf32>, vector<128x128xf32>, vector<8x128xf32> -> vector<8x128xf32>
    %25 = arith.addf %22, %24 : vector<8x128xf32>
    %c0_15 = arith.constant 0 : index
    %c0_16 = arith.constant 0 : index
    %26 = vector.load %arg8[%c0_15, %c0_16] : memref<8x128xf32, #tpu.memory_space<vmem>>, vector<8x128xf32>
    tpu.vector_store %arg8[%c0_15, %c0_16], %25 {strides = array<i32>} : memref<8x128xf32, #tpu.memory_space<vmem>>, vector<8x128xf32>,
    %c3_i32 = arith.constant 3 : i32
    %27 = arith.cmpi eq, %arg1, %c3_i32 : i32
    %28 = arith.extui %27 : i1 to i32
    %c0_i32_17 = arith.constant 0 : i32
    %29 = arith.cmpi ne, %28, %c0_i32_17 : i32
    scf.if %29 {
      %c0_18 = arith.constant 0 : index
      %c0_19 = arith.constant 0 : index
      %30 = vector.load %arg8[%c0_18, %c0_19] : memref<8x128xf32, #tpu.memory_space<vmem>>, vector<8x128xf32>
      %31 = arith.addf %3, %30 : vector<8x128xf32>
      %c0_20 = arith.constant 0 : index
      %c0_21 = arith.constant 0 : index
      %32 = vector.load %arg7[%c0_20, %c0_21] : memref<8x128xf32, #tpu.memory_space<vmem>>, vector<8x128xf32>
      tpu.vector_store %arg7[%c0_20, %c0_21], %31 {strides = array<i32>} : memref<8x128xf32, #tpu.memory_space<vmem>>, vector<8x128xf32>,
    } else {
    }
    return
  }
  func.func @transform_0(%arg0: i32, %arg1: i32) -> (i32, i32) {
    %c0_i32 = arith.constant 0 : i32
    %c0_i32_0 = arith.constant 0 : i32
    return %arg0, %c0_i32 : i32, i32
  }
  func.func @transform_1(%arg0: i32, %arg1: i32) -> (i32, i32) {
    %c0_i32 = arith.constant 0 : i32
    %c0_i32_0 = arith.constant 0 : i32
    return %c0_i32, %arg1 : i32, i32
  }
  func.func @transform_2(%arg0: i32, %arg1: i32) -> (i32, i32) {
    %c0_i32 = arith.constant 0 : i32
    %c0_i32_0 = arith.constant 0 : i32
    return %c0_i32, %arg1 : i32, i32
  }
  func.func @transform_3(%arg0: i32, %arg1: i32) -> (i32, i32) {
    %c0_i32 = arith.constant 0 : i32
    %c0_i32_0 = arith.constant 0 : i32
    return %arg1, %c0_i32 : i32, i32
  }
  func.func @transform_4(%arg0: i32, %arg1: i32) -> (i32, i32) {
    %c0_i32 = arith.constant 0 : i32
    %c0_i32_0 = arith.constant 0 : i32
    %c0_i32_1 = arith.constant 0 : i32
    return %c0_i32, %c0_i32_0 : i32, i32
  }
  func.func @transform_5(%arg0: i32, %arg1: i32) -> (i32, i32) {
    %c0_i32 = arith.constant 0 : i32
    %c0_i32_0 = arith.constant 0 : i32
    return %arg0, %c0_i32 : i32, i32
  }
}

</mosaic_0001>

<bundles_post_ra>
// kernel: tpu_custom_call.1
= control target key start
LH: loop header
LB: loop body
LE: loop exit
PB: predicated region body
PF: predicated region fallthrough
CT: control target
= control target key end

     0   :  { %s1381_s0 = inlined_call_operand.hbm [shape: f32[16,128], index: 0, kind: input, shape index: {}]   ;;  %s1382_s1 = inlined_call_operand.hbm [shape: f32[128,512], index: 1, kind: input, shape index: {}]   ;;  %s1383_s2 = inlined_call_operand.hbm [shape: f32[1,512], index: 2, kind: input, shape index: {}]   ;;  %s1384_s3 = inlined_call_operand.hbm [shape: f32[512,128], index: 3, kind: input, shape index: {}]   ;;  %s1385_s4 = inlined_call_operand.vmem [shape: f32[1,128], index: 4, kind: input, shape index: {}]   ;;  %s1386_s5 = inlined_call_operand.hbm [shape: f32[16,128], index: 5, kind: output, shape index: {}]  }
   0x1   :  { %1399 = sst [smem:[#allocation26_spill]] %s1381_s0 }
   0x2   :  { %1400 = sst [smem:[#allocation27_spill]] %s1382_s1 }
   0x3   :  { %1401 = sst [smem:[#allocation28_spill]] %s1385_s4 }
   0x4   :  { %1402 = sst [smem:[#allocation29_spill]] %s1386_s5 }
   0x5   :  { %10 = vsyncpa [#allocation4], 0 }
   0x6   :  { %12 = vsyncpa [#allocation4 + $0x1], 0 }
   0x7   :  { %13 = vsyncpa [#allocation7], 0 }
   0x8   :  { %15 = vsyncpa [#allocation7 + $0x1], 0 }
   0x9   :  { %16 = vsyncpa [#allocation10], 0 }
   0xa   :  { %18 = vsyncpa [#allocation10 + $0x1], 0 }
   0xb   :  { %19 = vsyncpa [#allocation5], 0 }
   0xc   :  { %21 = vsyncpa [#allocation5 + $0x1], 0  ;;  %s1066_s18 = smov 0   ;;  %s1068_s19 = smov 0  }
   0xd   :  { %s1070_s20 = smov 0   ;;  %s1072_s21 = smov 0  }
   0xe   :  { %s1074_s22 = smov 0   ;;  %s1076_s23 = smov 0  }
   0xf   :  { %s1078_s24 = smov 0   ;;  %s1080_s25 = smov 0  }
  0x10   :  { %s1082_s26 = smov 0   ;;  %s1084_s27 = smov 0  }
  0x11   :  { %s1086_s28 = smov 0  }
  0x12 LB: > { %1403 = sst [smem:[#allocation16_spill]] %s999_s20  ;;  %p54_p0 = scmp.eq.s32.totalorder %s1031_s28, 0  ;;  %s1031_s28 = sphi %s1086_s28, %s27_s28   ;;  %s1027_s27 = sphi %s1084_s27, %s1439_s27   ;;  %s1023_s26 = sphi %s1082_s26, %s1446_s26   ;;  %s1019_s25 = sphi %s1080_s25, %s1445_s25   ;;  %s1015_s24 = sphi %s1078_s24, %s1444_s24   ;;  %s1011_s23 = sphi %s1076_s23, %s1436_s23   ;;  %s1007_s22 = sphi %s1074_s22, %s1443_s22   ;;  %s1003_s21 = sphi %s1072_s21, %s1442_s21   ;;  %s999_s20 = sphi %s1070_s20, %s1434_s20   ;;  %s995_s19 = sphi %s1068_s19, %s1441_s19   ;;  %s991_s18 = sphi %s1066_s18, %s1440_s18  }
  0x13   : > { %1404 = sst [smem:[#allocation17_spill]] %s1003_s21  ;;  %p79_p1 = scmp.ne.s32.totalorder %s999_s20, %s995_s19 }
  0x14   : > { %1405 = sst [smem:[#allocation18_spill]] %s1011_s23  ;;  %p1392_p2 = scmp.lt.s32.totalorder %s1031_s28, 8 }
  0x15   : > { %1406 = sst [smem:[#allocation19_spill]] %s1019_s25  ;;  %s230_s30 = sand.u32 1, %s1031_s28  }
  0x16   : > { %1407 = sst [smem:[#allocation20_spill]] %s1027_s27  ;;  %p81_p3 = por %p79_p1, %p54_p0 }
  0x17   : > { %s1130_s6 = sand.u32 1, %s999_s20   ;;  %s641_s7 = sshll.u32 %s1023_s26, 3 }
  0x18   : > { %s1387_s8 = sshll.u32 %s1130_s6, 7  ;;  %s1408_s1 = sld [smem:[#allocation27_spill]] }
  0x19   : > { %s234_s13 = scalar_lea.vmem [#allocation6], %s1387_s8  ;;  %p1141_p4 = pnand %p1392_p2, %p81_p3 }
  0x1a   : > { %s241_s14 = sshll.u32 %s234_s13, 4  ;;  %s1145_s16 = scalar_lea.sflag [#allocation7], %s230_s30  ;;  %s242_s14 = int_to_ptr.vmem [resolvable:$true] %s241_s14 }
  0x1b   : > { %s1033_s17 = smov 512   ;;  %s1389_s9 = smov 8  }
  0x1c   : > { %p645_p5 = scmp.ge.s32.totalorder %s1031_s28, 1  ;;  %p288_p6 = scmp.lt.s32.totalorder %s1031_s28, 9 }
  0x1d   : > { %s1159_s10 = sadd.s32 4294967295, %s1031_s28   ;;  %s36_s13 = sadd.s32 1, %s1023_s26 }
  0x1e   : > { %s238_s11 = scalar_lea.hbm %s1408_s1, %s641_s7  ;;  %s1388_s7 = smov 128  }
  0x1f   : > { %s239_s12 = sshll.u32 %s238_s11, 4  ;;  %p1154_p7 = pnand %p645_p5, %p288_p6  ;;  %s240_s12 = int_to_ptr.hbm [resolvable:$true] %s239_s12 }
  0x20   : > { %673 = dma.hbm_to_vmem [thread:$0]  (!%p1141_p4), %s240_s12, 2048, %s242_s14, %s1145_s16, %s1033_s17, %s1388_s7, %s1389_s9  }
  0x21   : > { %s635_s11 = sadd.s32 4294967294, %s1031_s28   ;;  %p37_p8 = scmp.ge.s32.totalorder %s36_s13, 4 }
  0x22   : > { %s39_s8 = sadd.s32 1, %s1027_s27  ;;  %s46_s12 = sadd.s32 1, %s1011_s23 }
  0x23   : > { %p53_p9 = scmp.ne.s32.totalorder %s1011_s23, %s1007_s22  ;;  %s1448_s13 = smov (%p37_p8, %s36_s13), 0 }
  0x24   : > { %1411 = sst [smem:[#allocation21_spill]] %s1448_s13  ;;  %s1450_s8 = smov (!%p37_p8, %s39_s8), %s1027_s27 }
  0x25   : > { %p1175_p10 = por %p54_p0, %p53_p9  ;;  %p59_p11 = scmp.ne.s32.totalorder %s1007_s22, %s1003_s21 }
  0x26   : > { %p41_p12 = scmp.ge.s32.totalorder %s1450_s8, 2  ;;  %p60_p13 = scmp.eq.s32.totalorder %s1159_s10, 0 }
  0x27   : > { %s69_s17 = ssub.s32 %s1023_s26, %s1448_s13  ;;  %p85_p1 = scmp.ne.s32.totalorder %s995_s19, %s991_s18 }
  0x28   : > { %s1452_s8 = smov (%p41_p12, %s1450_s8), 0  ;;  %p1191_p3 = por %p60_p13, %p59_p11 }
  0x29   : > { %1413 = sst [smem:[#allocation22_spill]] %s1452_s8  ;;  %p70_p0 = scmp.eq.s32.totalorder %s69_s17, 0 }
  0x2a   : > { %s43_s9 = ssub.s32 %s1027_s27, %s1452_s8  ;;  %p1197_p5 = por %p85_p1, %p60_p13 }
  0x2b   : > { %p44_p6 = scmp.eq.s32.totalorder %s43_s9, 0  ;;  %p182_p8 = scmp.eq.s32.totalorder %s1159_s10, 7 }
  0x2c   : > { %s1416_s1 = sadd.s32 1, %s999_s20  ;;  %p188_p2 = scmp.eq.s32.totalorder %s635_s11, 7 }
  0x2d   : > { %s1205_s18 = scalar_select %p70_p0, %s999_s20, %s1416_s1  }
  0x2e   : > { %s1208_s13 = scalar_select %p44_p6, %s1011_s23, %s46_s12  }
  0x2f   : > { %1417 = sst [smem:[#allocation23_spill]] %s1205_s18  ;;  %p1213_p12 = por %p182_p8, %p53_p9 }
  0x30   : > { %1418 = sst [smem:[#allocation24_spill]] %s1208_s13  ;;  %s211_s17 = sand.u32 1, %s1011_s23  }
  0x31   : > { %s639_s8 = sshll.u32 %s1027_s27, 3  ;;  %p1222_p13 = por %p188_p2, %p59_p11 }
  0x32   : > { %s638_s25 = sshll.u32 %s211_s17, 3  ;;  %s1422_s0 = sld [smem:[#allocation26_spill]] }
  0x33   : > { %s1420_s9 = scalar_select %p1222_p13, 1, 0 }
  0x34   : > { %s215_s11 = scalar_lea.vmem [#allocation3], %s638_s25  ;;  %p1423_p9 = scmp.lt.s32.totalorder %s1031_s28, 8 }
  0x35   : > { %1421 = sst [smem:[#allocation25_spill]] %s1420_s9  ;;  %s223_s23 = sshll.u32 %s215_s11, 4  ;;  %s224_s23 = int_to_ptr.vmem [resolvable:$true] %s223_s23 }
  0x36   : > { %p668_p2 = pnand %p1423_p9, %p1175_p10  ;;  %s257_s20 = scalar_lea.hbm %s1383_s2, %s1023_s26 }
  0x37   : > { %s259_s9 = sshll.u32 %s257_s20, 4  ;;  %s212_s4 = scalar_lea.sflag [#allocation4], %s211_s17  ;;  %s260_s9 = int_to_ptr.hbm [resolvable:$true] %s259_s9 }
  0x38   : > { %s219_s12 = scalar_lea.hbm %s1422_s0, %s639_s8  ;;  %s254_s8 = scalar_lea.vmem [#allocation8], %s1130_s6 }
  0x39   : > { %s221_s13 = sshll.u32 %s219_s12, 4  ;;  %s261_s1 = sshll.u32 %s254_s8, 4  ;;  %s222_s13 = int_to_ptr.hbm [resolvable:$true] %s221_s13  ;;  %s262_s1 = int_to_ptr.vmem [resolvable:$true] %s261_s1 }
  0x3a   : > { %670 = dma.hbm_to_vmem [thread:$0]  (!%p668_p2), %s222_s13, 128, %s224_s23, %s212_s4  }
  0x3b   : > { %676 = dma.hbm_to_vmem [thread:$0]  (!%p1141_p4), %s260_s9, 16, %s262_s1, %s1145_s16  }
  0x3c   : > { %s656_s25 = sshll.u32 %s1023_s26, 7  ;;  %s1424_s0 = sshll.u32 %s1130_s6, 7 }
  0x3d   : > { %s277_s11 = scalar_lea.hbm %s1384_s3, %s656_s25  ;;  %s272_s21 = scalar_lea.vmem [#allocation9], %s1424_s0 }
  0x3e   : > { %s280_s27 = sshll.u32 %s272_s21, 4  ;;  %s278_s18 = sshll.u32 %s277_s11, 4  ;;  %s281_s27 = int_to_ptr.vmem [resolvable:$true] %s280_s27  ;;  %s279_s18 = int_to_ptr.hbm [resolvable:$true] %s278_s18 }
  0x3f   : > { %s269_s20 = scalar_lea.sflag [#allocation10], %s1130_s6  ;;  %s1425_s23 = smov 8  }
  0x40   : > { %s1426_s13 = smov 128   ;;  %292 = sbr.rel (%p1154_p7) target bundleno = 427 (0x1ab), region = 40 }
  0x41   : > { %679 = dma.hbm_to_vmem [thread:$0]  (!%p1141_p4), %s279_s18, 2048, %s281_s27, %s269_s20, %s1426_s13, %s1426_s13, %s1425_s23  }
  0x42   : > { %s1256_s16 = sand.u32 (!%p1154_p7), 1, %s1007_s22  }
  0x43   : > { %s646_s0 = sshll.u32 (!%p1154_p7), %s1256_s16, 3  ;;  %s295_s21 = scalar_lea.sflag (!%p1154_p7), [#allocation4], %s1256_s16 }
  0x44   : > { %s1260_s17 = scalar_lea.vmem (!%p1154_p7), [#allocation3], %s646_s0 }
  0x45   : > { %974 = dma.done.wait (%p1191_p3), %s295_s21, 128  }
  0x46   : > { %976 = vsyncadd (%p1191_p3), %s295_s21, 4294967168  ;;  %s304_s6 = sand.u32 1, %s1159_s10   ;;  %s1268_s15 = sand.u32 1, %s995_s19  }
  0x47   : > { %s647_s30 = sshll.u32 %s1268_s15, 7  ;;  %s305_s9 = scalar_lea.sflag [#allocation7], %s304_s6 }
  0x48   : > { %s1271_s4 = scalar_lea.vmem [#allocation6], %s647_s30 }
  0x49   : > { %978 = dma.done.wait (%p1197_p5), %s305_s9, 2064  }
  0x4a   : > { %980 = vsyncadd (%p1197_p5), %s305_s9, 4294965232  ;;  %s317_s7 = scalar_lea.vmem [#allocation8], %s1268_s15  ;;  %s324_s8 = scalar_lea.sflag [#allocation10], %s1268_s15 }
  0x4b   : > { %s1279_s1 = scalar_lea.vmem [#allocation9], %s647_s30 }
  0x4c   : > { %982 = dma.done.wait (%p1197_p5), %s324_s8, 2048  }
  0x4d   : > { %984 = vsyncadd (%p1197_p5), %s324_s8, 4294965248  ;;  %s1285_s10 = scalar_lea.vmem [#allocation11], %s646_s0  ;;  %p650_p4 = scmp.ne.s32.totalorder %s1015_s24, 0 }
  0x4e   : > { %s1427_s14 = sld [smem:[#allocation28_spill]] (!%p650_p4) }
  0x4f   : > { %373 = sbr.rel (%p650_p4) target bundleno = 86 (0x56), region = 60 }
  0x54   : > { %v777_v0 = vld [vmem:[%s1427_s14] ss:$0 sm:$0xff] }
  0x55   : > { %378 = vst [vmem:[#allocation2] sm:$0xff] %v777_v0 }
  0x56 PF: > { %v395_v1 = vld [vmem:[%s1271_s4 + $0x78] sm:$0xff]  ;;  %v394_v2 = vld [vmem:[%s1271_s4 + $0x70] sm:$0xff]  ;;  %v393_v3 = vld [vmem:[%s1271_s4 + $0x68] sm:$0xff]  ;;  %p651_p7 = scmp.ne.s32.totalorder %s1015_s24, 3 }
  0x57   : > { %400 = vmatpush.msra.mxu0 %v395_v1  ;;  %v392_v4 = vld [vmem:[%s1271_s4 + $0x60] sm:$0xff]  ;;  %v391_v6 = vld [vmem:[%s1271_s4 + $0x58] sm:$0xff]  ;;  %v443_v8 = vld [vmem:[%s1279_s1 + $0x68] sm:$0xff] }
  0x58   : > { %v445_v5 = vld [vmem:[%s1279_s1 + $0x78] sm:$0xff]  ;;  %v444_v7 = vld [vmem:[%s1279_s1 + $0x70] sm:$0xff]  ;;  %v442_v10 = vld [vmem:[%s1279_s1 + $0x60] sm:$0xff] }
  0x59   : > { %401 = vmatpush.msra.mxu0 %v394_v2  ;;  %446 = vmatpush.msra.mxu1 %v445_v5  ;;  %v390_v9 = vld [vmem:[%s1271_s4 + $0x50] sm:$0xff]  ;;  %v389_v11 = vld [vmem:[%s1271_s4 + $0x48] sm:$0xff]  ;;  %v388_v12 = vld [vmem:[%s1271_s4 + $0x40] sm:$0xff] }
  0x5a   : > { %v387_v13 = vld [vmem:[%s1271_s4 + $0x38] sm:$0xff]  ;;  %v386_v14 = vld [vmem:[%s1271_s4 + $0x30] sm:$0xff]  ;;  %v385_v15 = vld [vmem:[%s1271_s4 + $0x28] sm:$0xff] }
  0x5b   : > { %402 = vmatpush.msra.mxu0 %v393_v3  ;;  %447 = vmatpush.msra.mxu1 %v444_v7  ;;  %v384_v16 = vld [vmem:[%s1271_s4 + $0x20] sm:$0xff]  ;;  %v383_v17 = vld [vmem:[%s1271_s4 + $0x18] sm:$0xff]  ;;  %v382_v18 = vld [vmem:[%s1271_s4 + $0x10] sm:$0xff] }
  0x5c   : > { %v381_v19 = vld [vmem:[%s1271_s4 + $0x8] sm:$0xff]  ;;  %v380_v20 = vld [vmem:[%s1271_s4] sm:$0xff]  ;;  %v379_v21 = vld [vmem:[%s1260_s17] sm:$0xff] }
  0x5d   : > { %403 = vmatpush.msra.mxu0 %v392_v4  ;;  %448 = vmatpush.msra.mxu1 %v443_v8  ;;  %v441_v22 = vld [vmem:[%s1279_s1 + $0x58] sm:$0xff]  ;;  %v440_v23 = vld [vmem:[%s1279_s1 + $0x50] sm:$0xff]  ;;  %v439_v24 = vld [vmem:[%s1279_s1 + $0x48] sm:$0xff] }
  0x5e   : > { %v438_v25 = vld [vmem:[%s1279_s1 + $0x40] sm:$0xff]  ;;  %v437_v26 = vld [vmem:[%s1279_s1 + $0x38] sm:$0xff]  ;;  %v436_v27 = vld [vmem:[%s1279_s1 + $0x30] sm:$0xff] }
  0x5f   : > { %404 = vmatpush.msra.mxu0 %v391_v6  ;;  %449 = vmatpush.msra.mxu1 %v442_v10  ;;  %v435_v28 = vld [vmem:[%s1279_s1 + $0x28] sm:$0xff]  ;;  %v434_v29 = vld [vmem:[%s1279_s1 + $0x20] sm:$0xff]  ;;  %v433_v30 = vld [vmem:[%s1279_s1 + $0x18] sm:$0xff] }
  0x60   : > { %v432_v31 = vld [vmem:[%s1279_s1 + $0x10] sm:$0xff]  ;;  %v431_v32 = vld [vmem:[%s1279_s1 + $0x8] sm:$0xff]  ;;  %v430_v33 = vld [vmem:[%s1279_s1] sm:$0xff] }
  0x61   : > { %405 = vmatpush.msra.mxu0 %v390_v9  ;;  %450 = vmatpush.msra.mxu1 %v441_v22  ;;  %v778_v34 = vld [vmem:[%s317_s7] ss:$0 sm:$0xff] }
  0x62   : > { %v429_v46 = vld [vmem:[#allocation2] sm:$0xff] }
  0x63   : > { %406 = vmatpush.msra.mxu0 %v389_v11  ;;  %451 = vmatpush.msra.mxu1 %v440_v23 }
  0x65   : > { %407 = vmatpush.msra.mxu0 %v388_v12  ;;  %452 = vmatpush.msra.mxu1 %v439_v24 }
  0x67   : > { %408 = vmatpush.msra.mxu0 %v387_v13  ;;  %453 = vmatpush.msra.mxu1 %v438_v25 }
  0x69   : > { %409 = vmatpush.msra.mxu0 %v386_v14  ;;  %454 = vmatpush.msra.mxu1 %v437_v26 }
  0x6b   : > { %410 = vmatpush.msra.mxu0 %v385_v15  ;;  %455 = vmatpush.msra.mxu1 %v436_v27 }
  0x6d   : > { %411 = vmatpush.msra.mxu0 %v384_v16  ;;  %456 = vmatpush.msra.mxu1 %v435_v28 }
  0x6f   : > { %412 = vmatpush.msra.mxu0 %v383_v17  ;;  %457 = vmatpush.msra.mxu1 %v434_v29 }
  0x71   : > { %413 = vmatpush.msra.mxu0 %v382_v18  ;;  %458 = vmatpush.msra.mxu1 %v433_v30 }
  0x73   : > { %414 = vmatpush.msra.mxu0 %v381_v19  ;;  %459 = vmatpush.msra.mxu1 %v432_v31 }
  0x75   : > { %415 = vmatpush.msra.mxu0 %v380_v20  ;;  %460 = vmatpush.msra.mxu1 %v431_v32 }
  0x76   : > { %416 = vmatmul.f32.vlgmr.msra.gmra.mxu0 %v379_v21 }
  0x77   : > { %461 = vmatpush.msra.mxu1 %v430_v33 }
  0xf3   : > { %v417_v35 = vpop.f32.mrf.mxu0 }
  0xf4   : > { %v418_v36 = vadd.f32 %v778_v34, %v417_v35 }
  0xf6   : > { %v421_v37 = vmul.f32 0.044715, %v418_v36  ;;  %v420_v43 = vmul.f32 0.5, %v418_v36 }
  0xf8   : > { %v422_v38 = vmul.f32 %v421_v37, %v418_v36 }
  0xfa   : > { %v423_v39 = vmul.f32 %v422_v38, %v418_v36 }
  0xfc   : > { %v424_v40 = vadd.f32 %v423_v39, %v418_v36 }
  0xfe   : > { %v425_v41 = vmul.f32 0.7978846, %v424_v40 }
 0x100   : > { %779 = vtanh.f32 %v425_v41 }
 0x106   : > { %v780_v42 = vpop.eup %779 }
 0x107   : > { %v427_v44 = vadd.f32 1.0, %v780_v42 }
 0x109   : > { %v428_v45 = vmul.f32 %v427_v44, %v420_v43 }
 0x10b   : > { %462 = vmatmul.f32.vlgmr.msra.gmra.mxu1 %v428_v45 }
 0x187   : > { %471 = sbr.rel (%p651_p7) target bundleno = 406 (0x196), region = 64 }
 0x188   : > { %v463_v47 = vpop.f32.mrf.mxu1 }
 0x189   : > { %v466_v48 = vadd.f32 %v463_v47, %v429_v46 }
 0x18b   : > { %467 = vst [vmem:[#allocation2] sm:$0xff] %v466_v48 }
 0x192   : > { %v472_v49 = vld [vmem:[#allocation2] sm:$0xff] }
 0x193   : > { %v473_v50 = vadd.f32 %v472_v49, %v379_v21 }
 0x195   : > { %474 = vst [vmem:[%s1285_s10] sm:$0xff] %v473_v50 }
 0x196 PF: > { %s1428_s29 = sld [smem:[#allocation19_spill]]  ;;  %s488_s0 = sshll.u32 %s1285_s10, 4  ;;  %s489_s0 = int_to_ptr.vmem [resolvable:$true] %s488_s0 }
 0x197   : > { %s1429_s20 = sld [smem:[#allocation29_spill]]  ;;  %s476_s24 = scalar_lea.sflag [#allocation5], %s1256_s16 }
 0x19c   : > { %s653_s11 = sshll.u32 %s1428_s29, 3 }
 0x19d   : > { %s1430_s13 = smov %s1429_s20  ;;  %s486_s23 = scalar_lea.hbm %s1429_s20, %s653_s11 }
 0x19e   : > { %s490_s21 = sshll.u32 %s486_s23, 4  ;;  %s921_s9 = scalar_lea.hbm %s1430_s13, 16  ;;  %s491_s21 = int_to_ptr.hbm [resolvable:$true] %s490_s21 }
 0x19f   : > { %s915_s17 = sshra.s32 %s491_s21, 4  ;;  %s916_s17 = int_to_ptr.hbm [resolvable:$true] %s915_s17 }
 0x1a0   : > { %s917_s6 = scalar_lea.hbm %s916_s17, 8  ;;  %p922_p3 = scmp.lt.s32.totalorder %s916_s17, %s1430_s13 }
 0x1a1   : > { %p918_p10 = scmp.ne.s32.totalorder %s916_s17, %s917_s6  ;;  %p923_p0 = scmp.lt.s32.totalorder %s921_s9, %s917_s6 }
 0x1a3   : > { %p919_p11 = pnand %p918_p10, %p1213_p12  ;;  %p924_p5 = por %p923_p0, %p922_p3 }
 0x1a5   : > { %p920_p1 = pneg %p919_p11 }
 0x1a7   : > { %p925_p6 = pnand %p924_p5, %p920_p1 }
 0x1a9   : > { %928 = shalt.err (!%p925_p6)
}
 0x1aa   : > { %665 = dma.vmem_to_hbm [thread:$0]  (%p1213_p12), %s489_s0, 128, %s491_s21, %s476_s24  }
 0x1ab PF: > { %s1431_s16 = sld [smem:[#allocation17_spill]]  ;;  %p685_p8 = scmp.ge.s32.totalorder %s1031_s28, 2 }
 0x1ad   : > { %p681_p9 = pnand %p685_p8, %p1222_p13 }
 0x1af   : > { %p682_p2 = pneg %p681_p9 }
 0x1b1   : > { %s502_s1 = sand.u32 1, %s1431_s16  }
 0x1b2   : > { %s503_s10 = scalar_lea.sflag [#allocation5], %s502_s1 }
 0x1b3   : > { %986 = dma.done.wait (%p682_p2), %s503_s10, 128  }
 0x1b4   : > { %988 = vsyncadd (%p682_p2), %s503_s10, 4294967168  ;;  %s27_s28 = sadd.s32 1, %s1031_s28   ;;  %s1433_s25 = sld [smem:[#allocation16_spill]] }
 0x1b5   : > { %p24_p4 = scmp.ge.s32.totalorder %s27_s28, 10   ;;  %s1434_s20 = sld [smem:[#allocation23_spill]] }
 0x1b6   : > { %s1435_s5 = sld [smem:[#allocation18_spill]]  ;;  %s1440_s18 = smov %s995_s19 }
 0x1b7   : > { %s1436_s23 = sld [smem:[#allocation24_spill]]  ;;  %s1442_s21 = smov %s1007_s22 }
 0x1b8   : > { %s1437_s12 = sld [smem:[#allocation20_spill]]  ;;  %s1444_s24 = smov %s1023_s26 }
 0x1b9   : > { %s1438_s14 = sld [smem:[#allocation21_spill]] }
 0x1ba   : > { %s1439_s27 = sld [smem:[#allocation22_spill]]  ;;  %s1441_s19 = smov %s1433_s25 }
 0x1bb   :  { %26 = sbr.rel (!%p24_p4) target bundleno = 18 (0x12), region = 130 }
 0x1bc   : > { %s1443_s22 = smov %s1435_s5 }
 0x1be   : > { %s1445_s25 = smov %s1437_s12 }
 0x1bf   : > { %s1446_s26 = smov %s1438_s14 }
 0x1c0   :  { %509 = vsyncpa [#allocation4], 1 }
 0x1c1   :  { %511 = vsyncpa [#allocation4 + $0x1], 1 }
 0x1c2   :  { %512 = vsyncpa [#allocation7], 1 }
 0x1c3   :  { %514 = vsyncpa [#allocation7 + $0x1], 1 }
 0x1c4   :  { %515 = vsyncpa [#allocation10], 1 }
 0x1c5   :  { %517 = vsyncpa [#allocation10 + $0x1], 1 }
 0x1c6   :  { %518 = vsyncpa [#allocation5], 1 }
 0x1c7   :  { %520 = vsyncpa [#allocation5 + $0x1], 1 }

</bundles_post_ra>
